<compile_context>
chip_gen: v7x
topology: tpu7x:2x2x1
jax: 0.10.0
libtpu: 0.0.40
codegen_flags: <defaults>
</compile_context>

<pallas_src>
import jax
import jax.numpy as jnp
from jax.experimental import pallas as pl
from jax.experimental.pallas import tpu as pltpu

EPS = 1e-5  # PyTorch InstanceNorm2d default eps


def _make_conv_block_kernel(H, W, C_in, C_out):
    Hp, Wp = H + 2, W + 2
    HPWP = Hp * Wp
    # Tap shifts in the padded-flat domain, tap order (dy, dx) row-major.
    shifts = [dy * Wp + dx for dy in range(3) for dx in range(3)]
    inv_n = 1.0 / float(H * W)
    head = Wp + 1  # re-centering offset between stages (one padded row + one column)

    def stage(x_ext, w_ref, mask):
        # x_ext: (C, >= HPWP + 2*Wp + 2) padded-flat activation (zeros outside the image).
        # w_ref: (9, C_out, C) per-tap weight matrices.
        acc = None
        for t, s in enumerate(shifts):
            x_s = x_ext[:, s:s + HPWP]                           # lane-shifted tap, (C, HPWP)
            part = jnp.dot(w_ref[t].astype(jnp.float32), x_s,
                           preferred_element_type=jnp.float32)   # (C_out, HPWP) on the MXU
            acc = part if acc is None else acc + part
        # InstanceNorm2d(affine=False): single-pass masked stats over the H*W valid lanes.
        am = acc * mask
        s1 = jnp.sum(am, axis=-1, keepdims=True)
        s2 = jnp.sum(am * am, axis=-1, keepdims=True)
        mean = s1 * inv_n
        var = jnp.maximum(s2 * inv_n - mean * mean, 0.0)
        y = (acc - mean) * jax.lax.rsqrt(var + EPS)
        y = jnp.maximum(y, 0.0)                                  # ReLU
        # TODO(synk): nn.Dropout2d is identity in eval mode; training-mode channel dropout not implemented.
        return y * mask                                          # zero the padding lanes

    def kernel(x_ref, w1_ref, w2_ref, mask_ref, o_ref):
        x = x_ref[0].astype(jnp.float32)                         # (C_in, NEXT)
        mask = mask_ref[...].astype(jnp.float32)                 # (1, HPWP), 1.0 on valid pixels
        h1 = stage(x, w1_ref, mask)                              # (C_out, HPWP), stays in VMEM
        z = jnp.zeros((C_out, head), jnp.float32)
        h_ext = jnp.concatenate([z, h1, z], axis=1)              # re-pad for stage-2 taps
        h2 = stage(h_ext, w2_ref, mask)
        o_ref[0] = h2.astype(o_ref.dtype)

    return kernel


def conv_block(x, params):
    """ConvBlock.forward. x: (B, C_in, H, W) NCHW; params = (w1, b1, w2, b2) in PyTorch layout.

    Biases are accepted for API parity but not used by the kernel: InstanceNorm2d(affine=False)
    subtracts the per-channel mean, which exactly cancels a per-channel constant bias.
    """
    w1, _b1, w2, _b2 = params
    B, C_in, H, W = x.shape
    C_out = w1.shape[0]
    Hp, Wp = H + 2, W + 2
    HPWP = Hp * Wp
    NEXT = ((HPWP + 2 * Wp + 2 + 127) // 128) * 128              # lane-dense, fits all 9 tap shifts

    # Padded-flat input: (B, C_in, NEXT), zeros outside the HxW image.
    xp = jnp.pad(x, ((0, 0), (0, 0), (1, 1), (1, 1))).reshape(B, C_in, HPWP)
    x_ext = jnp.pad(xp, ((0, 0), (0, 0), (0, NEXT - HPWP)))

    # Per-tap weight matrices, tap order (dy, dx) row-major: (9, C_out, C).
    w1_t = jnp.transpose(w1, (2, 3, 0, 1)).reshape(9, C_out, C_in)
    w2_t = jnp.transpose(w2, (2, 3, 0, 1)).reshape(9, C_out, C_out)

    # Valid-pixel mask in the padded-flat output domain (p = h*Wp + w, h < H, w < W).
    p = jnp.arange(HPWP, dtype=jnp.int32)
    mask = (((p // Wp) < H) & ((p % Wp) < W)).astype(jnp.float32).reshape(1, HPWP)

    kernel = _make_conv_block_kernel(H, W, C_in, C_out)
    out_flat = pl.pallas_call(
        kernel,
        out_shape=jax.ShapeDtypeStruct((B, C_out, HPWP), x.dtype),
        grid=(B,),
        in_specs=[
            pl.BlockSpec((1, C_in, NEXT), lambda b: (b, 0, 0)),
            pl.BlockSpec((9, C_out, C_in), lambda b: (0, 0, 0)),
            pl.BlockSpec((9, C_out, C_out), lambda b: (0, 0, 0)),
            pl.BlockSpec((1, HPWP), lambda b: (0, 0)),
        ],
        out_specs=pl.BlockSpec((1, C_out, HPWP), lambda b: (b, 0, 0)),
        compiler_params=pltpu.CompilerParams(
            dimension_semantics=("parallel",),
            vmem_limit_bytes=32 * 1024 * 1024,
        ),
    )(x_ext, w1_t, w2_t, mask)

    # Extract the valid HxW window (values live at p = h*Wp + w).
    return out_flat.reshape(B, C_out, Hp, Wp)[:, :, :H, :W]


def conv_block_ref(x, params):
    """Pure-JAX reference (keeps the conv bias, two-pass variance) for correctness checking."""
    w1, b1, w2, b2 = params

    def conv(x, w, b):
        y = jax.lax.conv_general_dilated(
            x, w, window_strides=(1, 1), padding=((1, 1), (1, 1)),
            dimension_numbers=("NCHW", "OIHW", "NCHW"))
        return y + b[None, :, None, None]

    def inorm_relu(y):
        m = y.mean(axis=(2, 3), keepdims=True)
        v = ((y - m) ** 2).mean(axis=(2, 3), keepdims=True)
        return jnp.maximum((y - m) * jax.lax.rsqrt(v + EPS), 0.0)

    h = inorm_relu(conv(x, w1, b1))
    return inorm_relu(conv(h, w2, b2))


if __name__ == "__main__":
    B, in_chans, out_chans, H, W = 2, 4, 8, 16, 16
    drop_prob = 0.1  # unused at inference (Dropout2d is identity in eval mode)

    key = jax.random.PRNGKey(0)
    kx, kw1, kb1, kw2, kb2 = jax.random.split(key, 5)
    x = jax.random.normal(kx, (B, in_chans, H, W), dtype=jnp.float32)
    w1 = 0.1 * jax.random.normal(kw1, (out_chans, in_chans, 3, 3), dtype=jnp.float32)
    b1 = 0.05 * jax.random.normal(kb1, (out_chans,), dtype=jnp.float32)
    w2 = 0.1 * jax.random.normal(kw2, (out_chans, out_chans, 3, 3), dtype=jnp.float32)
    b2 = 0.05 * jax.random.normal(kb2, (out_chans,), dtype=jnp.float32)
    params = (w1, b1, w2, b2)

    out = jax.block_until_ready(conv_block(x, params))
    ref = jax.block_until_ready(conv_block_ref(x, params))

    assert out.shape == (B, out_chans, H, W), out.shape
    assert jnp.allclose(out, ref, atol=1e-4, rtol=1e-4), float(jnp.max(jnp.abs(out - ref)))
    print("KERNEL_OK")
</pallas_src>

<mosaic_0001>
module attributes {stable_mosaic.version = 11 : i64} {
  func.func @kernel(%arg0: i32, %arg1: memref<1x4x384xf32, #tpu.memory_space<vmem>>, %arg2: memref<9x8x4xf32, #tpu.memory_space<vmem>>, %arg3: memref<9x8x8xf32, #tpu.memory_space<vmem>>, %arg4: memref<1x324xf32, #tpu.memory_space<vmem>>, %arg5: memref<1x8x324xf32, #tpu.memory_space<vmem>>) attributes {dimension_semantics = [#tpu.dimension_semantics<parallel>], iteration_bounds = array<i64: 2>, scalar_prefetch = 0 : i64, scratch_operands = 0 : i64, tpu.core_type = #tpu.core_type<tc>, window_params = [{transform_indices = @transform_0, window_bounds = array<i64: 1, 4, 384>}, {pipeline_mode = #tpu.pipeline_mode<synchronous>, transform_indices = @transform_1, window_bounds = array<i64: 9, 8, 4>}, {pipeline_mode = #tpu.pipeline_mode<synchronous>, transform_indices = @transform_2, window_bounds = array<i64: 9, 8, 8>}, {pipeline_mode = #tpu.pipeline_mode<synchronous>, transform_indices = @transform_3, window_bounds = array<i64: 1, 324>}, {transform_indices = @transform_4, window_bounds = array<i64: 1, 8, 324>}]} {
    %c0 = arith.constant 0 : index
    %c0_0 = arith.constant 0 : index
    %c0_1 = arith.constant 0 : index
    %0 = vector.load %arg1[%c0, %c0_0, %c0_1] : memref<1x4x384xf32, #tpu.memory_space<vmem>>, vector<1x4x384xf32>
    %1 = vector.shape_cast %0 : vector<1x4x384xf32> to vector<4x384xf32>
    %c0_2 = arith.constant 0 : index
    %c0_3 = arith.constant 0 : index
    %2 = vector.load %arg4[%c0_2, %c0_3] : memref<1x324xf32, #tpu.memory_space<vmem>>, vector<1x324xf32>
    %3 = vector.extract_strided_slice %1 {offsets = [0, 0], sizes = [4, 324], strides = [1, 1]} : vector<4x384xf32> to vector<4x324xf32>
    %c0_4 = arith.constant 0 : index
    %c0_5 = arith.constant 0 : index
    %c0_6 = arith.constant 0 : index
    %4 = vector.load %arg2[%c0_4, %c0_5, %c0_6] : memref<9x8x4xf32, #tpu.memory_space<vmem>>, vector<1x8x4xf32>
    %5 = vector.shape_cast %4 : vector<1x8x4xf32> to vector<8x4xf32>
    %cst = arith.constant dense<0.000000e+00> : vector<8x324xf32>
    %6 = tpu.matmul %5, %3, %cst {dimension_numbers = #tpu.dot_dimension_numbers<[1], [0], [0], [1], [0, 0, 1, 1], [], []>} : vector<8x4xf32>, vector<4x324xf32>, vector<8x324xf32> -> vector<8x324xf32>
    %7 = vector.extract_strided_slice %1 {offsets = [0, 1], sizes = [4, 324], strides = [1, 1]} : vector<4x384xf32> to vector<4x324xf32>
    %c1 = arith.constant 1 : index
    %c0_7 = arith.constant 0 : index
    %c0_8 = arith.constant 0 : index
    %8 = vector.load %arg2[%c1, %c0_7, %c0_8] : memref<9x8x4xf32, #tpu.memory_space<vmem>>, vector<1x8x4xf32>
    %9 = vector.shape_cast %8 : vector<1x8x4xf32> to vector<8x4xf32>
    %cst_9 = arith.constant dense<0.000000e+00> : vector<8x324xf32>
    %10 = tpu.matmul %9, %7, %cst_9 {dimension_numbers = #tpu.dot_dimension_numbers<[1], [0], [0], [1], [0, 0, 1, 1], [], []>} : vector<8x4xf32>, vector<4x324xf32>, vector<8x324xf32> -> vector<8x324xf32>
    %11 = arith.addf %6, %10 : vector<8x324xf32>
    %12 = vector.extract_strided_slice %1 {offsets = [0, 2], sizes = [4, 324], strides = [1, 1]} : vector<4x384xf32> to vector<4x324xf32>
    %c2 = arith.constant 2 : index
    %c0_10 = arith.constant 0 : index
    %c0_11 = arith.constant 0 : index
    %13 = vector.load %arg2[%c2, %c0_10, %c0_11] : memref<9x8x4xf32, #tpu.memory_space<vmem>>, vector<1x8x4xf32>
    %14 = vector.shape_cast %13 : vector<1x8x4xf32> to vector<8x4xf32>
    %cst_12 = arith.constant dense<0.000000e+00> : vector<8x324xf32>
    %15 = tpu.matmul %14, %12, %cst_12 {dimension_numbers = #tpu.dot_dimension_numbers<[1], [0], [0], [1], [0, 0, 1, 1], [], []>} : vector<8x4xf32>, vector<4x324xf32>, vector<8x324xf32> -> vector<8x324xf32>
    %16 = arith.addf %11, %15 : vector<8x324xf32>
    %17 = vector.extract_strided_slice %1 {offsets = [0, 18], sizes = [4, 324], strides = [1, 1]} : vector<4x384xf32> to vector<4x324xf32>
    %c3 = arith.constant 3 : index
    %c0_13 = arith.constant 0 : index
    %c0_14 = arith.constant 0 : index
    %18 = vector.load %arg2[%c3, %c0_13, %c0_14] : memref<9x8x4xf32, #tpu.memory_space<vmem>>, vector<1x8x4xf32>
    %19 = vector.shape_cast %18 : vector<1x8x4xf32> to vector<8x4xf32>
    %cst_15 = arith.constant dense<0.000000e+00> : vector<8x324xf32>
    %20 = tpu.matmul %19, %17, %cst_15 {dimension_numbers = #tpu.dot_dimension_numbers<[1], [0], [0], [1], [0, 0, 1, 1], [], []>} : vector<8x4xf32>, vector<4x324xf32>, vector<8x324xf32> -> vector<8x324xf32>
    %21 = arith.addf %16, %20 : vector<8x324xf32>
    %22 = vector.extract_strided_slice %1 {offsets = [0, 19], sizes = [4, 324], strides = [1, 1]} : vector<4x384xf32> to vector<4x324xf32>
    %c4 = arith.constant 4 : index
    %c0_16 = arith.constant 0 : index
    %c0_17 = arith.constant 0 : index
    %23 = vector.load %arg2[%c4, %c0_16, %c0_17] : memref<9x8x4xf32, #tpu.memory_space<vmem>>, vector<1x8x4xf32>
    %24 = vector.shape_cast %23 : vector<1x8x4xf32> to vector<8x4xf32>
    %cst_18 = arith.constant dense<0.000000e+00> : vector<8x324xf32>
    %25 = tpu.matmul %24, %22, %cst_18 {dimension_numbers = #tpu.dot_dimension_numbers<[1], [0], [0], [1], [0, 0, 1, 1], [], []>} : vector<8x4xf32>, vector<4x324xf32>, vector<8x324xf32> -> vector<8x324xf32>
    %26 = arith.addf %21, %25 : vector<8x324xf32>
    %27 = vector.extract_strided_slice %1 {offsets = [0, 20], sizes = [4, 324], strides = [1, 1]} : vector<4x384xf32> to vector<4x324xf32>
    %c5 = arith.constant 5 : index
    %c0_19 = arith.constant 0 : index
    %c0_20 = arith.constant 0 : index
    %28 = vector.load %arg2[%c5, %c0_19, %c0_20] : memref<9x8x4xf32, #tpu.memory_space<vmem>>, vector<1x8x4xf32>
    %29 = vector.shape_cast %28 : vector<1x8x4xf32> to vector<8x4xf32>
    %cst_21 = arith.constant dense<0.000000e+00> : vector<8x324xf32>
    %30 = tpu.matmul %29, %27, %cst_21 {dimension_numbers = #tpu.dot_dimension_numbers<[1], [0], [0], [1], [0, 0, 1, 1], [], []>} : vector<8x4xf32>, vector<4x324xf32>, vector<8x324xf32> -> vector<8x324xf32>
    %31 = arith.addf %26, %30 : vector<8x324xf32>
    %32 = vector.extract_strided_slice %1 {offsets = [0, 36], sizes = [4, 324], strides = [1, 1]} : vector<4x384xf32> to vector<4x324xf32>
    %c6 = arith.constant 6 : index
    %c0_22 = arith.constant 0 : index
    %c0_23 = arith.constant 0 : index
    %33 = vector.load %arg2[%c6, %c0_22, %c0_23] : memref<9x8x4xf32, #tpu.memory_space<vmem>>, vector<1x8x4xf32>
    %34 = vector.shape_cast %33 : vector<1x8x4xf32> to vector<8x4xf32>
    %cst_24 = arith.constant dense<0.000000e+00> : vector<8x324xf32>
    %35 = tpu.matmul %34, %32, %cst_24 {dimension_numbers = #tpu.dot_dimension_numbers<[1], [0], [0], [1], [0, 0, 1, 1], [], []>} : vector<8x4xf32>, vector<4x324xf32>, vector<8x324xf32> -> vector<8x324xf32>
    %36 = arith.addf %31, %35 : vector<8x324xf32>
    %37 = vector.extract_strided_slice %1 {offsets = [0, 37], sizes = [4, 324], strides = [1, 1]} : vector<4x384xf32> to vector<4x324xf32>
    %c7 = arith.constant 7 : index
    %c0_25 = arith.constant 0 : index
    %c0_26 = arith.constant 0 : index
    %38 = vector.load %arg2[%c7, %c0_25, %c0_26] : memref<9x8x4xf32, #tpu.memory_space<vmem>>, vector<1x8x4xf32>
    %39 = vector.shape_cast %38 : vector<1x8x4xf32> to vector<8x4xf32>
    %cst_27 = arith.constant dense<0.000000e+00> : vector<8x324xf32>
    %40 = tpu.matmul %39, %37, %cst_27 {dimension_numbers = #tpu.dot_dimension_numbers<[1], [0], [0], [1], [0, 0, 1, 1], [], []>} : vector<8x4xf32>, vector<4x324xf32>, vector<8x324xf32> -> vector<8x324xf32>
    %41 = arith.addf %36, %40 : vector<8x324xf32>
    %42 = vector.extract_strided_slice %1 {offsets = [0, 38], sizes = [4, 324], strides = [1, 1]} : vector<4x384xf32> to vector<4x324xf32>
    %c8 = arith.constant 8 : index
    %c0_28 = arith.constant 0 : index
    %c0_29 = arith.constant 0 : index
    %43 = vector.load %arg2[%c8, %c0_28, %c0_29] : memref<9x8x4xf32, #tpu.memory_space<vmem>>, vector<1x8x4xf32>
    %44 = vector.shape_cast %43 : vector<1x8x4xf32> to vector<8x4xf32>
    %cst_30 = arith.constant dense<0.000000e+00> : vector<8x324xf32>
    %45 = tpu.matmul %44, %42, %cst_30 {dimension_numbers = #tpu.dot_dimension_numbers<[1], [0], [0], [1], [0, 0, 1, 1], [], []>} : vector<8x4xf32>, vector<4x324xf32>, vector<8x324xf32> -> vector<8x324xf32>
    %46 = arith.addf %41, %45 : vector<8x324xf32>
    %47 = vector.broadcast %2 : vector<1x324xf32> to vector<8x324xf32>
    %48 = arith.mulf %46, %47 : vector<8x324xf32>
    %cst_31 = arith.constant dense<0.000000e+00> : vector<8xf32>
    %49 = vector.multi_reduction <add>, %48, %cst_31 [1] : vector<8x324xf32> to vector<8xf32>
    %50 = vector.shape_cast %49 : vector<8xf32> to vector<8x1xf32>
    %51 = arith.mulf %48, %48 : vector<8x324xf32>
    %cst_32 = arith.constant dense<0.000000e+00> : vector<8xf32>
    %52 = vector.multi_reduction <add>, %51, %cst_32 [1] : vector<8x324xf32> to vector<8xf32>
    %53 = vector.shape_cast %52 : vector<8xf32> to vector<8x1xf32>
    %cst_33 = arith.constant 3.906250e-03 : f32
    %54 = vector.broadcast %cst_33 : f32 to vector<8x1xf32>
    %55 = arith.mulf %50, %54 : vector<8x1xf32>
    %cst_34 = arith.constant 3.906250e-03 : f32
    %56 = vector.broadcast %cst_34 : f32 to vector<8x1xf32>
    %57 = arith.mulf %53, %56 : vector<8x1xf32>
    %58 = arith.mulf %55, %55 : vector<8x1xf32>
    %59 = arith.subf %57, %58 : vector<8x1xf32>
    %cst_35 = arith.constant 0.000000e+00 : f32
    %60 = vector.broadcast %cst_35 : f32 to vector<8x1xf32>
    %61 = arith.maximumf %59, %60 : vector<8x1xf32>
    %62 = vector.broadcast %55 : vector<8x1xf32> to vector<8x324xf32>
    %63 = arith.subf %46, %62 : vector<8x324xf32>
    %cst_36 = arith.constant 9.99999974E-6 : f32
    %64 = vector.broadcast %cst_36 : f32 to vector<8x1xf32>
    %65 = arith.addf %61, %64 : vector<8x1xf32>
    %66 = math.rsqrt %65 : vector<8x1xf32>
    %67 = vector.broadcast %66 : vector<8x1xf32> to vector<8x324xf32>
    %68 = arith.mulf %63, %67 : vector<8x324xf32>
    %cst_37 = arith.constant 0.000000e+00 : f32
    %69 = vector.broadcast %cst_37 : f32 to vector<8x324xf32>
    %70 = arith.maximumf %68, %69 : vector<8x324xf32>
    %71 = vector.broadcast %2 : vector<1x324xf32> to vector<8x324xf32>
    %72 = arith.mulf %70, %71 : vector<8x324xf32>
    %cst_38 = arith.constant 0.000000e+00 : f32
    %73 = vector.broadcast %cst_38 : f32 to vector<8x19xf32>
    %74 = tpu.concatenate %73, %72, %73 in 1 : vector<8x19xf32>, vector<8x324xf32>, vector<8x19xf32> -> vector<8x362xf32>
    %75 = vector.extract_strided_slice %74 {offsets = [0, 0], sizes = [8, 324], strides = [1, 1]} : vector<8x362xf32> to vector<8x324xf32>
    %c0_39 = arith.constant 0 : index
    %c0_40 = arith.constant 0 : index
    %c0_41 = arith.constant 0 : index
    %76 = vector.load %arg3[%c0_39, %c0_40, %c0_41] : memref<9x8x8xf32, #tpu.memory_space<vmem>>, vector<1x8x8xf32>
    %77 = vector.shape_cast %76 : vector<1x8x8xf32> to vector<8x8xf32>
    %cst_42 = arith.constant dense<0.000000e+00> : vector<8x324xf32>
    %78 = tpu.matmul %77, %75, %cst_42 {dimension_numbers = #tpu.dot_dimension_numbers<[1], [0], [0], [1], [0, 0, 1, 1], [], []>} : vector<8x8xf32>, vector<8x324xf32>, vector<8x324xf32> -> vector<8x324xf32>
    %79 = vector.extract_strided_slice %74 {offsets = [0, 1], sizes = [8, 324], strides = [1, 1]} : vector<8x362xf32> to vector<8x324xf32>
    %c1_43 = arith.constant 1 : index
    %c0_44 = arith.constant 0 : index
    %c0_45 = arith.constant 0 : index
    %80 = vector.load %arg3[%c1_43, %c0_44, %c0_45] : memref<9x8x8xf32, #tpu.memory_space<vmem>>, vector<1x8x8xf32>
    %81 = vector.shape_cast %80 : vector<1x8x8xf32> to vector<8x8xf32>
    %cst_46 = arith.constant dense<0.000000e+00> : vector<8x324xf32>
    %82 = tpu.matmul %81, %79, %cst_46 {dimension_numbers = #tpu.dot_dimension_numbers<[1], [0], [0], [1], [0, 0, 1, 1], [], []>} : vector<8x8xf32>, vector<8x324xf32>, vector<8x324xf32> -> vector<8x324xf32>
    %83 = arith.addf %78, %82 : vector<8x324xf32>
    %84 = vector.extract_strided_slice %74 {offsets = [0, 2], sizes = [8, 324], strides = [1, 1]} : vector<8x362xf32> to vector<8x324xf32>
    %c2_47 = arith.constant 2 : index
    %c0_48 = arith.constant 0 : index
    %c0_49 = arith.constant 0 : index
    %85 = vector.load %arg3[%c2_47, %c0_48, %c0_49] : memref<9x8x8xf32, #tpu.memory_space<vmem>>, vector<1x8x8xf32>
    %86 = vector.shape_cast %85 : vector<1x8x8xf32> to vector<8x8xf32>
    %cst_50 = arith.constant dense<0.000000e+00> : vector<8x324xf32>
    %87 = tpu.matmul %86, %84, %cst_50 {dimension_numbers = #tpu.dot_dimension_numbers<[1], [0], [0], [1], [0, 0, 1, 1], [], []>} : vector<8x8xf32>, vector<8x324xf32>, vector<8x324xf32> -> vector<8x324xf32>
    %88 = arith.addf %83, %87 : vector<8x324xf32>
    %89 = vector.extract_strided_slice %74 {offsets = [0, 18], sizes = [8, 324], strides = [1, 1]} : vector<8x362xf32> to vector<8x324xf32>
    %c3_51 = arith.constant 3 : index
    %c0_52 = arith.constant 0 : index
    %c0_53 = arith.constant 0 : index
    %90 = vector.load %arg3[%c3_51, %c0_52, %c0_53] : memref<9x8x8xf32, #tpu.memory_space<vmem>>, vector<1x8x8xf32>
    %91 = vector.shape_cast %90 : vector<1x8x8xf32> to vector<8x8xf32>
    %cst_54 = arith.constant dense<0.000000e+00> : vector<8x324xf32>
    %92 = tpu.matmul %91, %89, %cst_54 {dimension_numbers = #tpu.dot_dimension_numbers<[1], [0], [0], [1], [0, 0, 1, 1], [], []>} : vector<8x8xf32>, vector<8x324xf32>, vector<8x324xf32> -> vector<8x324xf32>
    %93 = arith.addf %88, %92 : vector<8x324xf32>
    %94 = vector.extract_strided_slice %74 {offsets = [0, 19], sizes = [8, 324], strides = [1, 1]} : vector<8x362xf32> to vector<8x324xf32>
    %c4_55 = arith.constant 4 : index
    %c0_56 = arith.constant 0 : index
    %c0_57 = arith.constant 0 : index
    %95 = vector.load %arg3[%c4_55, %c0_56, %c0_57] : memref<9x8x8xf32, #tpu.memory_space<vmem>>, vector<1x8x8xf32>
    %96 = vector.shape_cast %95 : vector<1x8x8xf32> to vector<8x8xf32>
    %cst_58 = arith.constant dense<0.000000e+00> : vector<8x324xf32>
    %97 = tpu.matmul %96, %94, %cst_58 {dimension_numbers = #tpu.dot_dimension_numbers<[1], [0], [0], [1], [0, 0, 1, 1], [], []>} : vector<8x8xf32>, vector<8x324xf32>, vector<8x324xf32> -> vector<8x324xf32>
    %98 = arith.addf %93, %97 : vector<8x324xf32>
    %99 = vector.extract_strided_slice %74 {offsets = [0, 20], sizes = [8, 324], strides = [1, 1]} : vector<8x362xf32> to vector<8x324xf32>
    %c5_59 = arith.constant 5 : index
    %c0_60 = arith.constant 0 : index
    %c0_61 = arith.constant 0 : index
    %100 = vector.load %arg3[%c5_59, %c0_60, %c0_61] : memref<9x8x8xf32, #tpu.memory_space<vmem>>, vector<1x8x8xf32>
    %101 = vector.shape_cast %100 : vector<1x8x8xf32> to vector<8x8xf32>
    %cst_62 = arith.constant dense<0.000000e+00> : vector<8x324xf32>
    %102 = tpu.matmul %101, %99, %cst_62 {dimension_numbers = #tpu.dot_dimension_numbers<[1], [0], [0], [1], [0, 0, 1, 1], [], []>} : vector<8x8xf32>, vector<8x324xf32>, vector<8x324xf32> -> vector<8x324xf32>
    %103 = arith.addf %98, %102 : vector<8x324xf32>
    %104 = vector.extract_strided_slice %74 {offsets = [0, 36], sizes = [8, 324], strides = [1, 1]} : vector<8x362xf32> to vector<8x324xf32>
    %c6_63 = arith.constant 6 : index
    %c0_64 = arith.constant 0 : index
    %c0_65 = arith.constant 0 : index
    %105 = vector.load %arg3[%c6_63, %c0_64, %c0_65] : memref<9x8x8xf32, #tpu.memory_space<vmem>>, vector<1x8x8xf32>
    %106 = vector.shape_cast %105 : vector<1x8x8xf32> to vector<8x8xf32>
    %cst_66 = arith.constant dense<0.000000e+00> : vector<8x324xf32>
    %107 = tpu.matmul %106, %104, %cst_66 {dimension_numbers = #tpu.dot_dimension_numbers<[1], [0], [0], [1], [0, 0, 1, 1], [], []>} : vector<8x8xf32>, vector<8x324xf32>, vector<8x324xf32> -> vector<8x324xf32>
    %108 = arith.addf %103, %107 : vector<8x324xf32>
    %109 = vector.extract_strided_slice %74 {offsets = [0, 37], sizes = [8, 324], strides = [1, 1]} : vector<8x362xf32> to vector<8x324xf32>
    %c7_67 = arith.constant 7 : index
    %c0_68 = arith.constant 0 : index
    %c0_69 = arith.constant 0 : index
    %110 = vector.load %arg3[%c7_67, %c0_68, %c0_69] : memref<9x8x8xf32, #tpu.memory_space<vmem>>, vector<1x8x8xf32>
    %111 = vector.shape_cast %110 : vector<1x8x8xf32> to vector<8x8xf32>
    %cst_70 = arith.constant dense<0.000000e+00> : vector<8x324xf32>
    %112 = tpu.matmul %111, %109, %cst_70 {dimension_numbers = #tpu.dot_dimension_numbers<[1], [0], [0], [1], [0, 0, 1, 1], [], []>} : vector<8x8xf32>, vector<8x324xf32>, vector<8x324xf32> -> vector<8x324xf32>
    %113 = arith.addf %108, %112 : vector<8x324xf32>
    %114 = vector.extract_strided_slice %74 {offsets = [0, 38], sizes = [8, 324], strides = [1, 1]} : vector<8x362xf32> to vector<8x324xf32>
    %c8_71 = arith.constant 8 : index
    %c0_72 = arith.constant 0 : index
    %c0_73 = arith.constant 0 : index
    %115 = vector.load %arg3[%c8_71, %c0_72, %c0_73] : memref<9x8x8xf32, #tpu.memory_space<vmem>>, vector<1x8x8xf32>
    %116 = vector.shape_cast %115 : vector<1x8x8xf32> to vector<8x8xf32>
    %cst_74 = arith.constant dense<0.000000e+00> : vector<8x324xf32>
    %117 = tpu.matmul %116, %114, %cst_74 {dimension_numbers = #tpu.dot_dimension_numbers<[1], [0], [0], [1], [0, 0, 1, 1], [], []>} : vector<8x8xf32>, vector<8x324xf32>, vector<8x324xf32> -> vector<8x324xf32>
    %118 = arith.addf %113, %117 : vector<8x324xf32>
    %119 = vector.broadcast %2 : vector<1x324xf32> to vector<8x324xf32>
    %120 = arith.mulf %118, %119 : vector<8x324xf32>
    %cst_75 = arith.constant dense<0.000000e+00> : vector<8xf32>
    %121 = vector.multi_reduction <add>, %120, %cst_75 [1] : vector<8x324xf32> to vector<8xf32>
    %122 = vector.shape_cast %121 : vector<8xf32> to vector<8x1xf32>
    %123 = arith.mulf %120, %120 : vector<8x324xf32>
    %cst_76 = arith.constant dense<0.000000e+00> : vector<8xf32>
    %124 = vector.multi_reduction <add>, %123, %cst_76 [1] : vector<8x324xf32> to vector<8xf32>
    %125 = vector.shape_cast %124 : vector<8xf32> to vector<8x1xf32>
    %cst_77 = arith.constant 3.906250e-03 : f32
    %126 = vector.broadcast %cst_77 : f32 to vector<8x1xf32>
    %127 = arith.mulf %122, %126 : vector<8x1xf32>
    %cst_78 = arith.constant 3.906250e-03 : f32
    %128 = vector.broadcast %cst_78 : f32 to vector<8x1xf32>
    %129 = arith.mulf %125, %128 : vector<8x1xf32>
    %130 = arith.mulf %127, %127 : vector<8x1xf32>
    %131 = arith.subf %129, %130 : vector<8x1xf32>
    %cst_79 = arith.constant 0.000000e+00 : f32
    %132 = vector.broadcast %cst_79 : f32 to vector<8x1xf32>
    %133 = arith.maximumf %131, %132 : vector<8x1xf32>
    %134 = vector.broadcast %127 : vector<8x1xf32> to vector<8x324xf32>
    %135 = arith.subf %118, %134 : vector<8x324xf32>
    %cst_80 = arith.constant 9.99999974E-6 : f32
    %136 = vector.broadcast %cst_80 : f32 to vector<8x1xf32>
    %137 = arith.addf %133, %136 : vector<8x1xf32>
    %138 = math.rsqrt %137 : vector<8x1xf32>
    %139 = vector.broadcast %138 : vector<8x1xf32> to vector<8x324xf32>
    %140 = arith.mulf %135, %139 : vector<8x324xf32>
    %cst_81 = arith.constant 0.000000e+00 : f32
    %141 = vector.broadcast %cst_81 : f32 to vector<8x324xf32>
    %142 = arith.maximumf %140, %141 : vector<8x324xf32>
    %143 = vector.broadcast %2 : vector<1x324xf32> to vector<8x324xf32>
    %144 = arith.mulf %142, %143 : vector<8x324xf32>
    %c0_82 = arith.constant 0 : index
    %c0_83 = arith.constant 0 : index
    %c0_84 = arith.constant 0 : index
    %145 = vector.load %arg5[%c0_82, %c0_83, %c0_84] : memref<1x8x324xf32, #tpu.memory_space<vmem>>, vector<1x8x324xf32>
    %146 = vector.shape_cast %145 : vector<1x8x324xf32> to vector<8x324xf32>
    %147 = vector.shape_cast %144 : vector<8x324xf32> to vector<1x8x324xf32>
    tpu.vector_store %arg5[%c0_82, %c0_83, %c0_84], %147 {strides = array<i32>} : memref<1x8x324xf32, #tpu.memory_space<vmem>>, vector<1x8x324xf32>,
    return
  }
  func.func @transform_0(%arg0: i32) -> (i32, i32, i32) {
    %c0_i32 = arith.constant 0 : i32
    %c0_i32_0 = arith.constant 0 : i32
    %c0_i32_1 = arith.constant 0 : i32
    return %arg0, %c0_i32, %c0_i32_0 : i32, i32, i32
  }
  func.func @transform_1(%arg0: i32) -> (i32, i32, i32) {
    %c0_i32 = arith.constant 0 : i32
    %c0_i32_0 = arith.constant 0 : i32
    %c0_i32_1 = arith.constant 0 : i32
    %c0_i32_2 = arith.constant 0 : i32
    return %c0_i32, %c0_i32_0, %c0_i32_1 : i32, i32, i32
  }
  func.func @transform_2(%arg0: i32) -> (i32, i32, i32) {
    %c0_i32 = arith.constant 0 : i32
    %c0_i32_0 = arith.constant 0 : i32
    %c0_i32_1 = arith.constant 0 : i32
    %c0_i32_2 = arith.constant 0 : i32
    return %c0_i32, %c0_i32_0, %c0_i32_1 : i32, i32, i32
  }
  func.func @transform_3(%arg0: i32) -> (i32, i32) {
    %c0_i32 = arith.constant 0 : i32
    %c0_i32_0 = arith.constant 0 : i32
    %c0_i32_1 = arith.constant 0 : i32
    return %c0_i32, %c0_i32_0 : i32, i32
  }
  func.func @transform_4(%arg0: i32) -> (i32, i32, i32) {
    %c0_i32 = arith.constant 0 : i32
    %c0_i32_0 = arith.constant 0 : i32
    %c0_i32_1 = arith.constant 0 : i32
    return %arg0, %c0_i32, %c0_i32_0 : i32, i32, i32
  }
}

</mosaic_0001>

<bundles_post_ra>
// kernel: tpu_custom_call.1
= control target key start
LH: loop header
LB: loop body
LE: loop exit
PB: predicated region body
PF: predicated region fallthrough
CT: control target
= control target key end

     0   :  { %9 = vsyncpa [#allocation3], 0  ;;  %s4111_s0 = inlined_call_operand.vmem [shape: f32[2,4,384], index: 0, kind: input, shape index: {}]   ;;  %s4112_s1 = inlined_call_operand.vmem [shape: f32[9,8,4], index: 1, kind: input, shape index: {}]   ;;  %s4113_s2 = inlined_call_operand.vmem [shape: f32[9,8,8], index: 2, kind: input, shape index: {}]   ;;  %s4114_s3 = inlined_call_operand.vmem [shape: f32[1,324], index: 3, kind: input, shape index: {}]   ;;  %s4115_s4 = inlined_call_operand.hbm [shape: f32[2,8,324], index: 4, kind: output, shape index: {}]  }
   0x1   :  { %11 = vsyncpa [#allocation3 + $0x1], 0  ;;  %s3710_s15 = smov 0   ;;  %s3712_s16 = smov 0  }
   0x2   :  { %s3714_s17 = smov 0   ;;  %s3716_s18 = smov 0  }
   0x3 LB: > { %s3731_s19 = sadd.s32 4294967295, %s3671_s18   ;;  %s3271_s20 = sadd.s32 4294967294, %s3671_s18   ;;  %s3671_s18 = sphi %s3716_s18, %s4121_s18   ;;  %s3667_s17 = sphi %s3714_s17, %s4120_s17   ;;  %s3663_s16 = sphi %s3712_s16, %s4119_s16   ;;  %s3659_s15 = sphi %s3710_s15, %s4118_s15  }
   0x4   : > { %s3735_s21 = sadd.s32 1, %s3671_s18   ;;  %s113_s22 = sadd.s32 1, %s3667_s17 }
   0x5   : > { %s110_s23 = ssub.s32 %s3671_s18, %s3735_s21  ;;  %p123_p0 = scmp.ne.s32.totalorder %s3667_s17, %s3663_s16 }
   0x6   : > { %p111_p1 = scmp.eq.s32.totalorder %s110_s23, 0  ;;  %p124_p2 = scmp.eq.s32.totalorder %s3731_s19, 1 }
   0x7   : > { %p129_p3 = scmp.ne.s32.totalorder %s3663_s16, %s3659_s15  ;;  %p130_p4 = scmp.eq.s32.totalorder %s3271_s20, 1 }
   0x8   : > { %s3746_s24 = scalar_select %p111_p1, %s3667_s17, %s113_s22  }
   0x9   : > { %p3748_p5 = por %p124_p2, %p123_p0  ;;  %p3752_p6 = por %p130_p4, %p129_p3 }
   0xa   : > { %p3274_p7 = scmp.ge.s32.totalorder %s3671_s18, 1  ;;  %p165_p8 = scmp.lt.s32.totalorder %s3671_s18, 3 }
   0xc   : > { %p166_p9 = pnand %p3274_p7, %p165_p8 }
   0xd   : > { %p191_p10 = scmp.lt.s32.totalorder (!%p166_p9), %s3731_s19, 1  ;;  %v3673_v0 = vmov (!%p166_p9), 0.0   ;;  %vm3674_vm0 = vmmov (!%p166_p9), 0   ;;  %s3675_s6 = smov (!%p166_p9), 127   ;;  %vm218_vm1 = vcmask (!%p166_p9), 1043456   ;;  %vm211_vm2 = vcmask (!%p166_p9), 1039360  }
   0xe   : > { %169 = sbr.rel (%p166_p9) target bundleno = 1311 (0x51f), region = 36  ;;  %3397 = vmatprep.subr.mxu1 (!%p166_p9), %v3673_v0  ;;  %3399 = vmatprep.mubr.msk.f32.mxu1 (!%p166_p9), %vm3674_vm0, %v3673_v0  ;;  %s3676_s7 = smov (!%p166_p9), 126   ;;  %v3276_v7 = vld [vmem:[%s4112_s1 + $0x8] sm:$0xff] (!%p166_p9)  ;;  %vm214_vm3 = vcmask (!%p166_p9), 31744   ;;  %vm524_vm4 = vcmask (!%p166_p9), 1031168   ;;  %v199_v14 = vld [vmem:[%s4112_s1] sm:$0xff] (!%p166_p9)  ;;  %v1665_v53 = vlaneseq (!%p166_p9) }
   0xf   : > { %289 = vmatprep.mubr.f32.mxu0 (!%p166_p9), %v3673_v0  ;;  %s3677_s8 = smov (!%p166_p9), 110   ;;  %s3678_s9 = smov (!%p166_p9), 109   ;;  %vm688_vm5 = vcmask (!%p166_p9), 900096   ;;  %v3287_v21 = vld [vmem:[%s4112_s1 + $0x10] sm:$0xff] (!%p166_p9)  ;;  %vm852_vm6 = vcmask (!%p166_p9), 891904   ;;  %v3293_v27 = vld [vmem:[%s4112_s1 + $0x18] sm:$0xff] (!%p166_p9) }
  0x10   : > { %s3679_s10 = smov (!%p166_p9), 108   ;;  %s3680_s11 = smov (!%p166_p9), 92   ;;  %vm1016_vm7 = vcmask (!%p166_p9), 883712   ;;  %v3299_v33 = vld [vmem:[%s4112_s1 + $0x20] sm:$0xff] (!%p166_p9)  ;;  %vm1180_vm8 = vcmask (!%p166_p9), 752640   ;;  %v3305_v39 = vld [vmem:[%s4112_s1 + $0x28] sm:$0xff] (!%p166_p9) }
  0x11   : > { %s3681_s12 = smov (!%p166_p9), 91   ;;  %s3682_s13 = smov (!%p166_p9), 90   ;;  %vm1344_vm9 = vcmask (!%p166_p9), 744448   ;;  %v3311_v44 = vld [vmem:[%s4112_s1 + $0x30] sm:$0xff] (!%p166_p9)  ;;  %vm1508_vm10 = vcmask (!%p166_p9), 736256   ;;  %v3317_v50 = vld [vmem:[%s4112_s1 + $0x38] sm:$0xff] (!%p166_p9) }
  0x12   : > { %v3323_v52 = vld [vmem:[%s4112_s1 + $0x40] sm:$0xff] (!%p166_p9)  ;;  %v1666_v54 = vshrl.u32 (!%p166_p9), %v1665_v53, 7  ;;  %vm1684_vm11 = vcmask (!%p166_p9), 556032   ;;  %s3683_s22 = smov (!%p166_p9), 19   ;;  %vm1725_vm12 = vcmask (!%p166_p9), 154624   ;;  %vm1732_vm13 = vcmask (!%p166_p9), 711680  }
  0x13   : > { %v198_v56 = vld [vmem:[%s4114_s3] sm:$0x7] (!%p166_p9)  ;;  %vm1750_vm14 = vcmask (!%p166_p9), 64512   ;;  %vm3332_vm15 = vmneg (!%p166_p9), %vm1725_vm12 }
  0x14   : > { %v1675_v55 = vsub.s32 (!%p166_p9), 2, %v1666_v54  ;;  %v1667_v57 = vsub.s32 (!%p166_p9), 0, %v1666_v54  ;;  %v1671_v58 = vsub.s32 (!%p166_p9), 1, %v1666_v54 }
  0x15   : > { %s192_s27 = scalar_select %p191_p10, %s3731_s19, 1 }
  0x16   : > { %v3918_v59 = vrot.slane %v198_v56, %v1675_v55  ;;  %v3920_v60 = vrot.slane %v198_v56, %v1667_v57  ;;  %v3922_v62 = vrot.slane %v198_v56, %v1671_v58  ;;  %v3337_v56 = vld [vmem:[%s4113_s2 + $0x10] sm:$0xff] }
  0x17   : > { %s3552_s28 = smul.u32 12, %s192_s27 }
  0x19   : > { %s195_s5 = scalar_lea.vmem %s4111_s0, %s3552_s28  ;;  %s3684_s28 = smov [#allocation2]  }
  0x1a   : > { %v196_v1 = vld [vmem:[%s195_s5] sm:$0xff]  ;;  %v197_v3 = vld [vmem:[%s195_s5 + $0x8] sm:$0xf]  ;;  %s3613_s29 = sshll.u32 %s3684_s28, 4  ;;  %s3614_s29 = int_to_ptr.vmem [resolvable:$false] %s3613_s29 }
  0x1b   : > { %205 = vrot.lane.b32.xlu1 %v196_v1, %s3675_s6  ;;  %v204_v2 = vcombine.high %v196_v1, %v196_v1  ;;  %s3615_s30 = scalar_lea.vmem %s3614_s29, 768 }
  0x1d   : > { %207 = vrot.lane.b32.xlu0 %v204_v2, %s3675_s6 }
  0x1f   : > { %520 = vrot.lane.b32.xlu1 %v204_v2, %s3676_s7 }
  0x21   : > { %209 = vrot.lane.b32.xlu0 %v197_v3, %s3675_s6 }
  0x23   : > { %518 = vrot.lane.b32.xlu1 %v196_v1, %s3676_s7 }
  0x25   : > { %522 = vrot.lane.b32.xlu0 %v197_v3, %s3676_s7 }
  0x27   : > { %686 = vrot.lane.b32.xlu1 %v197_v3, %s3677_s8 }
  0x29   : > { %684 = vrot.lane.b32.xlu0 %v204_v2, %s3677_s8 }
  0x2b   : > { %848 = vrot.lane.b32.xlu1 %v204_v2, %s3678_s9 }
  0x2d   : > { %682 = vrot.lane.b32.xlu0 %v196_v1, %s3677_s8 }
  0x2f   : > { %846 = vrot.lane.b32.xlu1 %v196_v1, %s3678_s9 }
  0x31   : > { %850 = vrot.lane.b32.xlu0 %v197_v3, %s3678_s9 }
  0x33   : > { %1014 = vrot.lane.b32.xlu1 %v197_v3, %s3679_s10 }
  0x35   : > { %1012 = vrot.lane.b32.xlu0 %v204_v2, %s3679_s10 }
  0x37   : > { %1176 = vrot.lane.b32.xlu1 %v204_v2, %s3680_s11 }
  0x39   : > { %1010 = vrot.lane.b32.xlu0 %v196_v1, %s3679_s10 }
  0x3b   : > { %1174 = vrot.lane.b32.xlu1 %v196_v1, %s3680_s11 }
  0x3d   : > { %1178 = vrot.lane.b32.xlu0 %v197_v3, %s3680_s11 }
  0x3f   : > { %1342 = vrot.lane.b32.xlu1 %v197_v3, %s3681_s12 }
  0x41   : > { %1340 = vrot.lane.b32.xlu0 %v204_v2, %s3681_s12 }
  0x43   : > { %1504 = vrot.lane.b32.xlu1 %v204_v2, %s3682_s13 }
  0x45   : > { %1338 = vrot.lane.b32.xlu0 %v196_v1, %s3681_s12 }
  0x47   : > { %1502 = vrot.lane.b32.xlu1 %v196_v1, %s3682_s13 }
  0x49   : > { %1506 = vrot.lane.b32.xlu0 %v197_v3, %s3682_s13 }
  0x8d   : > { %v206_v4 = vpop.permute.xlu1 %205 }
  0x8f   : > { %v208_v5 = vpop.permute.xlu0 %207 }
  0x90   : > { %v212_v10 = vsel %vm211_vm2, %v206_v4, %v208_v5 }
  0x91   : > { %v521_v6 = vpop.permute.xlu1 %520 }
  0x93   : > { %v210_v8 = vpop.permute.xlu0 %209 }
  0x94   : > { %3398 = vmatpush3.msk.msra.mxu1 %vm218_vm1, %v210_v8  ;;  %v213_v9 = vsel %vm211_vm2, %v208_v5, %v210_v8 }
  0x95   : > { %3277 = vmatprep.subr.msk.mxu0 %vm218_vm1, %v213_v9  ;;  %3400 = vmatmul.mubr.msk.f32.vlgmr.msra.gmra.mrb[0].mxu1 %vm214_vm3, %v3276_v7  ;;  %v519_v11 = vpop.permute.xlu1 %518 }
  0x96   : > { %3278 = vmatpush1.msk.msra.mxu0 %vm218_vm1, %v212_v10  ;;  %3402 = vmatprep.subr.mxu1 %v3673_v0  ;;  %v525_v17 = vsel %vm524_vm4, %v519_v11, %v521_v6 }
  0x97   : > { %3279 = vmatmul.mubr.msk.f32.vlgmr.msra.gmra.mrb[0].mxu0 %vm214_vm3, %v3276_v7  ;;  %3282 = vmatprep.subr.msk.mxu0 %vm218_vm1, %v204_v2  ;;  %v523_v12 = vpop.permute.xlu0 %522 }
  0x98   : > { %3283 = vmatpush1.msk.msra.mxu0 %vm218_vm1, %v196_v1  ;;  %3403 = vmatpush3.msk.msra.mxu1 %vm218_vm1, %v197_v3  ;;  %v526_v13 = vsel %vm524_vm4, %v521_v6, %v523_v12 }
  0x99   : > { %3404 = vmatprep.mubr.msk.f32.mxu1 %vm3674_vm0, %v3673_v0  ;;  %439 = vmatprep.mubr.f32.mxu0 %v3673_v0  ;;  %v687_v16 = vpop.permute.xlu1 %686 }
  0x9a   : > { %3288 = vmatprep.subr.msk.mxu0 %vm218_vm1, %v526_v13  ;;  %3407 = vmatprep.subr.mxu1 %v3673_v0 }
  0x9b   : > { %v685_v15 = vpop.permute.xlu0 %684 }
  0x9c   : > { %v690_v18 = vsel %vm688_vm5, %v685_v15, %v687_v16 }
  0x9d   : > { %3405 = vmatmul.mubr.msk.f32.vlgmr.msra.gmra.mrb[0].mxu1 %vm214_vm3, %v199_v14  ;;  %v849_v20 = vpop.permute.xlu1 %848 }
  0x9e   : > { %3408 = vmatpush3.msk.msra.mxu1 %vm218_vm1, %v523_v12  ;;  %3409 = vmatprep.mubr.msk.f32.mxu1 %vm3674_vm0, %v3673_v0 }
  0x9f   : > { %3284 = vmatmul.mubr.msk.f32.vlgmr.msra.gmra.mrb[0].mxu0 %vm214_vm3, %v199_v14  ;;  %v683_v19 = vpop.permute.xlu0 %682  ;;  %3412 = vmatprep.subr.mxu1 %v3673_v0 }
  0xa0   : > { %3289 = vmatpush1.msk.msra.mxu0 %vm218_vm1, %v525_v17  ;;  %600 = vmatprep.mubr.f32.mxu0 %v3673_v0  ;;  %v689_v23 = vsel %vm688_vm5, %v683_v19, %v685_v15 }
  0xa1   : > { %3294 = vmatprep.subr.msk.mxu0 %vm218_vm1, %v690_v18  ;;  %v847_v25 = vpop.permute.xlu1 %846 }
  0xa2   : > { %v853_v29 = vsel %vm852_vm6, %v847_v25, %v849_v20 }
  0xa3   : > { %v851_v22 = vpop.permute.xlu0 %850 }
  0xa4   : > { %v854_v24 = vsel %vm852_vm6, %v849_v20, %v851_v22 }
  0xa5   : > { %3410 = vmatmul.mubr.msk.f32.vlgmr.msra.gmra.mrb[0].mxu1 %vm214_vm3, %v3287_v21  ;;  %v1015_v28 = vpop.permute.xlu1 %1014 }
  0xa6   : > { %3413 = vmatpush3.msk.msra.mxu1 %vm218_vm1, %v687_v16  ;;  %3414 = vmatprep.mubr.msk.f32.mxu1 %vm3674_vm0, %v3673_v0 }
  0xa7   : > { %3290 = vmatmul.mubr.msk.f32.vlgmr.msra.gmra.mrb[0].mxu0 %vm214_vm3, %v3287_v21  ;;  %3417 = vmatprep.subr.mxu1 %v3673_v0  ;;  %v1013_v26 = vpop.permute.xlu0 %1012 }
  0xa8   : > { %3295 = vmatpush1.msk.msra.mxu0 %vm218_vm1, %v689_v23  ;;  %764 = vmatprep.mubr.f32.mxu0 %v3673_v0  ;;  %v1018_v30 = vsel %vm1016_vm7, %v1013_v26, %v1015_v28 }
  0xa9   : > { %3300 = vmatprep.subr.msk.mxu0 %vm218_vm1, %v854_v24  ;;  %v1177_v32 = vpop.permute.xlu1 %1176 }
  0xab   : > { %v1011_v31 = vpop.permute.xlu0 %1010 }
  0xac   : > { %v1017_v35 = vsel %vm1016_vm7, %v1011_v31, %v1013_v26 }
  0xad   : > { %3415 = vmatmul.mubr.msk.f32.vlgmr.msra.gmra.mrb[0].mxu1 %vm214_vm3, %v3293_v27  ;;  %v1175_v37 = vpop.permute.xlu1 %1174 }
  0xae   : > { %3418 = vmatpush3.msk.msra.mxu1 %vm218_vm1, %v851_v22  ;;  %3419 = vmatprep.mubr.msk.f32.mxu1 %vm3674_vm0, %v3673_v0  ;;  %v1181_v41 = vsel %vm1180_vm8, %v1175_v37, %v1177_v32 }
  0xaf   : > { %3296 = vmatmul.mubr.msk.f32.vlgmr.msra.gmra.mrb[0].mxu0 %vm214_vm3, %v3293_v27  ;;  %3422 = vmatprep.subr.mxu1 %v3673_v0  ;;  %v1179_v34 = vpop.permute.xlu0 %1178 }
  0xb0   : > { %3301 = vmatpush1.msk.msra.mxu0 %vm218_vm1, %v853_v29  ;;  %928 = vmatprep.mubr.f32.mxu0 %v3673_v0  ;;  %v1182_v36 = vsel %vm1180_vm8, %v1177_v32, %v1179_v34 }
  0xb1   : > { %3306 = vmatprep.subr.msk.mxu0 %vm218_vm1, %v1018_v30  ;;  %v1343_v40 = vpop.permute.xlu1 %1342 }
  0xb3   : > { %v1341_v38 = vpop.permute.xlu0 %1340 }
  0xb4   : > { %v1346_v42 = vsel %vm1344_vm9, %v1341_v38, %v1343_v40 }
  0xb5   : > { %3420 = vmatmul.mubr.msk.f32.vlgmr.msra.gmra.mrb[0].mxu1 %vm214_vm3, %v3299_v33  ;;  %v1505_v46 = vpop.permute.xlu1 %1504 }
  0xb6   : > { %3423 = vmatpush3.msk.msra.mxu1 %vm218_vm1, %v1015_v28  ;;  %3424 = vmatprep.mubr.msk.f32.mxu1 %vm3674_vm0, %v3673_v0 }
  0xb7   : > { %3302 = vmatmul.mubr.msk.f32.vlgmr.msra.gmra.mrb[0].mxu0 %vm214_vm3, %v3299_v33  ;;  %3427 = vmatprep.subr.mxu1 %v3673_v0  ;;  %v1339_v43 = vpop.permute.xlu0 %1338 }
  0xb8   : > { %3307 = vmatpush1.msk.msra.mxu0 %vm218_vm1, %v1017_v35  ;;  %1092 = vmatprep.mubr.f32.mxu0 %v3673_v0  ;;  %v1345_v47 = vsel %vm1344_vm9, %v1339_v43, %v1341_v38  ;;  %v3329_v43 = vld [vmem:[%s4113_s2 + $0x8] sm:$0xff] }
  0xb9   : > { %3312 = vmatprep.subr.msk.mxu0 %vm218_vm1, %v1182_v36  ;;  %v1503_v49 = vpop.permute.xlu1 %1502 }
  0xba   : > { %v1509_v51 = vsel %vm1508_vm10, %v1503_v49, %v1505_v46 }
  0xbb   : > { %v1507_v45 = vpop.permute.xlu0 %1506 }
  0xbc   : > { %v1510_v48 = vsel %vm1508_vm10, %v1505_v46, %v1507_v45 }
  0xbd   : > { %3425 = vmatmul.mubr.msk.f32.vlgmr.msra.gmra.mrb[0].mxu1 %vm214_vm3, %v3305_v39 }
  0xbe   : > { %3428 = vmatpush3.msk.msra.mxu1 %vm218_vm1, %v1179_v34  ;;  %3429 = vmatprep.mubr.msk.f32.mxu1 %vm3674_vm0, %v3673_v0 }
  0xbf   : > { %3308 = vmatmul.mubr.msk.f32.vlgmr.msra.gmra.mrb[0].mxu0 %vm214_vm3, %v3305_v39  ;;  %3432 = vmatprep.subr.mxu1 %v3673_v0 }
  0xc0   : > { %3313 = vmatpush1.msk.msra.mxu0 %vm218_vm1, %v1181_v41  ;;  %1256 = vmatprep.mubr.f32.mxu0 %v3673_v0 }
  0xc1   : > { %3318 = vmatprep.subr.msk.mxu0 %vm218_vm1, %v1346_v42 }
  0xc5   : > { %3430 = vmatmul.mubr.msk.f32.vlgmr.msra.gmra.mrb[0].mxu1 %vm214_vm3, %v3311_v44 }
  0xc6   : > { %3433 = vmatpush3.msk.msra.mxu1 %vm218_vm1, %v1343_v40  ;;  %3434 = vmatprep.mubr.msk.f32.mxu1 %vm3674_vm0, %v3673_v0 }
  0xc7   : > { %3314 = vmatmul.mubr.msk.f32.vlgmr.msra.gmra.mrb[0].mxu0 %vm214_vm3, %v3311_v44  ;;  %3437 = vmatprep.subr.mxu1 %v3673_v0 }
  0xc8   : > { %3319 = vmatpush1.msk.msra.mxu0 %vm218_vm1, %v1345_v47  ;;  %1420 = vmatprep.mubr.f32.mxu0 %v3673_v0 }
  0xc9   : > { %3324 = vmatprep.subr.msk.mxu0 %vm218_vm1, %v1510_v48 }
  0xcd   : > { %3435 = vmatmul.mubr.msk.f32.vlgmr.msra.gmra.mrb[0].mxu1 %vm214_vm3, %v3317_v50 }
  0xce   : > { %3438 = vmatpush3.msk.msra.mxu1 %vm218_vm1, %v1507_v45  ;;  %3439 = vmatprep.mubr.msk.f32.mxu1 %vm3674_vm0, %v3673_v0 }
  0xcf   : > { %3320 = vmatmul.mubr.msk.f32.vlgmr.msra.gmra.mrb[0].mxu0 %vm214_vm3, %v3317_v50  ;;  %3442 = vmatprep.subr.mxu1 %v3673_v0 }
  0xd0   : > { %3325 = vmatpush1.msk.msra.mxu0 %vm218_vm1, %v1509_v51  ;;  %1584 = vmatprep.mubr.f32.mxu0 %v3673_v0  ;;  %v1734_v51 = vld [vmem:[%s4113_s2] sm:$0xff] }
  0xd5   : > { %3440 = vmatmul.mubr.msk.f32.vlgmr.msra.gmra.mrb[0].mxu1 %vm214_vm3, %v3323_v52 }
  0xd6   : > { %3444 = vmatprep.mubr.msk.f32.mxu1 %vm3674_vm0, %v3673_v0 }
  0xd7   : > { %3326 = vmatmul.mubr.msk.f32.vlgmr.msra.gmra.mrb[0].mxu0 %vm214_vm3, %v3323_v52 }
  0xd8   : > { %1818 = vmatprep.mubr.f32.mxu0 %v3673_v0 }
 0x1a8   : > { %v1657_v61 = vpop.f32.mrb[0].mxu1 }
 0x1a9   : > { %v1682_v63 = vmul.f32 %v3918_v59, %v1657_v61  ;;  %v3441_v1 = vpop.f32.mrb[1].mxu1 }
 0x1aa   : > { %v1586_v2 = vpop.f32.mrb[0].mxu0 }
 0x1ab   : > { %v1680_v3 = vmul.f32 %v3920_v60, %v1586_v2  ;;  %v1588_v4 = vpop.f32.mrb[1].mxu0  ;;  %v1691_v6 = vmul.f32 %v1682_v63, %v1682_v63  ;;  %v1685_v10 = vsel %vm1684_vm11, %v1682_v63, 0.0 }
 0x1ac   : > { %v1681_v5 = vmul.f32 %v3922_v62, %v1588_v4 }
 0x1ad   : > { %v1689_v7 = vmul.f32 %v1680_v3, %v1680_v3  ;;  %v1693_v13 = vsel %vm1684_vm11, %v1691_v6, 0.0 }
 0x1ae   : > { %v1690_v8 = vmul.f32 %v1681_v5, %v1681_v5  ;;  %v1683_v9 = vadd.f32 %v1681_v5, %v1680_v3 }
 0x1b0   : > { %v1686_v11 = vadd.f32 %v1685_v10, %v1683_v9  ;;  %v1692_v12 = vadd.f32 %v1690_v8, %v1689_v7  ;;  %v3343_v9 = vld [vmem:[%s4113_s2 + $0x20] sm:$0xff] }
 0x1b2   : > { %1687 = vadd.xlane.f32.xlu0 %v1686_v11  ;;  %v1694_v14 = vadd.f32 %v1693_v13, %v1692_v12 }
 0x1b4   : > { %1695 = vadd.xlane.f32.xlu1 %v1694_v14  ;;  %v3346_v14 = vld [vmem:[%s4113_s2 + $0x28] sm:$0xff] }
 0x23f   : > { %v1688_v15 = vpop.xlane.xlu0 %1687 }
 0x240   : > { %v1697_v16 = vmul.f32 0.00390625, %v1688_v15 }
 0x241   : > { %v1696_v17 = vpop.xlane.xlu1 %1695 }
 0x242   : > { %v1698_v18 = vmul.f32 0.00390625, %v1696_v17  ;;  %v1699_v19 = vmul.f32 %v1697_v16, %v1697_v16  ;;  %v1704_v23 = vsub.f32 %v1657_v61, %v1697_v16  ;;  %v1703_v24 = vsub.f32 %v1588_v4, %v1697_v16 }
 0x243   : > { %v1702_v25 = vsub.f32 %v1586_v2, %v1697_v16  ;;  %v3340_v2 = vld [vmem:[%s4113_s2 + $0x18] sm:$0xff] }
 0x244   : > { %v1700_v20 = vsub.f32 %v1698_v18, %v1699_v19  ;;  %v3349_v19 = vld [vmem:[%s4113_s2 + $0x30] sm:$0xff] }
 0x246   : > { %v1701_v21 = vmax.f32 %v1700_v20, 0.0 }
 0x248   : > { %v1705_v22 = vadd.f32 1e-05, %v1701_v21 }
 0x24a   : > { %3605 = vrsqrt.f32 %v1705_v22 }
 0x254   : > { %v3606_v26 = vpop.eup %3605 }
 0x255   : > { %v1709_v27 = vmul.f32 %v3606_v26, %v1704_v23  ;;  %v1708_v28 = vmul.f32 %v3606_v26, %v1703_v24  ;;  %v1707_v29 = vmul.f32 %v3606_v26, %v1702_v25  ;;  %v3352_v25 = vld [vmem:[%s4113_s2 + $0x38] sm:$0xff] }
 0x257   : > { %v1712_v30 = vmax.f32 %v1709_v27, 0.0  ;;  %v1711_v31 = vmax.f32 %v1708_v28, 0.0  ;;  %v1710_v34 = vmax.f32 %v1707_v29, 0.0 }
 0x259   : > { %v1715_v32 = vmul.f32 %v1712_v30, %v3918_v59  ;;  %v1714_v33 = vmul.f32 %v1711_v31, %v3922_v62  ;;  %v1713_v35 = vmul.f32 %v1710_v34, %v3920_v60  ;;  %v3355_v30 = vld [vmem:[%s4113_s2 + $0x40] sm:$0xff] }
 0x25b   : > { %1723 = vrot.lane.b32.xlu1 %v1715_v32, %s3683_s22  ;;  %1721 = vrot.lane.b32.xlu0 %v1714_v33, %s3683_s22 }
 0x25f   : > { %1719 = vrot.lane.b32.xlu0 %v1713_v35, %s3683_s22 }
 0x2cd   : > { %v1724_v36 = vpop.permute.xlu1 %1723  ;;  %v1722_v37 = vpop.permute.xlu0 %1721 }
 0x2ce   : > { %v1727_v38 = vsel %vm1725_vm12, %v1722_v37, %v1724_v36 }
 0x2cf   : > { %v1733_v39 = vsel %vm1732_vm13, %v1727_v38, 0.0 }
 0x2d0   : > { %1743 = vrot.lane.b32.xlu0 %v1733_v39, %s3675_s6 }
 0x2d1   : > { %v1720_v40 = vpop.permute.xlu0 %1719 }
 0x2d2   : > { %v1726_v41 = vsel %vm1725_vm12, %v1720_v40, %v1722_v37  ;;  %v1731_v42 = vsel %vm1725_vm12, 0.0, %v1720_v40 }
 0x2d3   : > { %1741 = vrot.lane.b32.xlu1 %v1726_v41, %s3675_s6 }
 0x2d4   : > { %2043 = vrot.lane.b32.xlu0 %v1726_v41, %s3676_s7 }
 0x2d7   : > { %1739 = vrot.lane.b32.xlu1 %v1731_v42, %s3675_s6 }
 0x2d8   : > { %2041 = vrot.lane.b32.xlu0 %v1731_v42, %s3676_s7 }
 0x2db   : > { %2045 = vrot.lane.b32.xlu1 %v1733_v39, %s3676_s7  ;;  %s188_s7 = sand.u32 1, %s3663_s16  }
 0x2dc   : > { %2205 = vrot.lane.b32.xlu0 %v1733_v39, %s3677_s8 }
 0x2df   : > { %2203 = vrot.lane.b32.xlu1 %v1726_v41, %s3677_s8 }
 0x2e0   : > { %2363 = vrot.lane.b32.xlu0 %v1726_v41, %s3678_s9 }
 0x2e3   : > { %2201 = vrot.lane.b32.xlu1 %v1731_v42, %s3677_s8  ;;  %s3551_s8 = smul.u32 24, %s188_s7 }
 0x2e4   : > { %2361 = vrot.lane.b32.xlu0 %v1731_v42, %s3678_s9 }
 0x2e7   : > { %2365 = vrot.lane.b32.xlu1 %v1733_v39, %s3678_s9  ;;  %s3553_s9 = smul.u32 384, %s3731_s19  ;;  %s3198_s19 = scalar_lea.sflag [#allocation3], %s188_s7 }
 0x2e8   : > { %2525 = vrot.lane.b32.xlu0 %v1733_v39, %s3679_s10 }
 0x2e9   : > { %s4068_s23 = scalar_lea.hbm %s4115_s4, %s3553_s9 }
 0x2eb   : > { %2523 = vrot.lane.b32.xlu1 %v1726_v41, %s3679_s10 }
 0x2ec   : > { %2683 = vrot.lane.b32.xlu0 %v1726_v41, %s3680_s11 }
 0x2ef   : > { %2521 = vrot.lane.b32.xlu1 %v1731_v42, %s3679_s10  ;;  %s190_s10 = scalar_lea.vmem [#allocation2], %s3551_s8 }
 0x2f0   : > { %2681 = vrot.lane.b32.xlu0 %v1731_v42, %s3680_s11 }
 0x2f3   : > { %2685 = vrot.lane.b32.xlu1 %v1733_v39, %s3680_s11  ;;  %s3212_s11 = sshll.u32 %s190_s10, 4  ;;  %s4070_s11 = int_to_ptr.vmem [resolvable:$true] %s3212_s11 }
 0x2f4   : > { %2845 = vrot.lane.b32.xlu0 %v1733_v39, %s3681_s12  ;;  %s3609_s27 = scalar_lea.vmem %s4070_s11, 384  ;;  %p3616_p0 = scmp.lt.s32.totalorder %s4070_s11, %s3614_s29 }
 0x2f5   : > { %p3610_p11 = scmp.ne.s32.totalorder %s4070_s11, %s3609_s27  ;;  %p3617_p1 = scmp.lt.s32.totalorder %s3615_s30, %s3609_s27 }
 0x2f7   : > { %2843 = vrot.lane.b32.xlu1 %v1726_v41, %s3681_s12  ;;  %p3611_p12 = pnand %p3610_p11, %p3748_p5  ;;  %p3618_p2 = por %p3617_p1, %p3616_p0 }
 0x2f8   : > { %3003 = vrot.lane.b32.xlu0 %v1726_v41, %s3682_s13 }
 0x2f9   : > { %p3612_p13 = pneg %p3611_p12 }
 0x2fb   : > { %2841 = vrot.lane.b32.xlu1 %v1731_v42, %s3681_s12  ;;  %p3619_p3 = pnand %p3618_p2, %p3612_p13 }
 0x2fc   : > { %3001 = vrot.lane.b32.xlu0 %v1731_v42, %s3682_s13 }
 0x2ff   : > { %3005 = vrot.lane.b32.xlu1 %v1733_v39, %s3682_s13 }
 0x342   : > { %v1744_v44 = vpop.permute.xlu0 %1743 }
 0x343   : > { %3443 = vmatpush3.msra.mxu1 %v1744_v44 }
 0x344   : > { %3445 = vmatmul.mubr.msk.f32.vlgmr.msra.gmra.mrb[2].mxu1 %vm1750_vm14, %v3329_v43  ;;  %3447 = vmatprep.subr.mxu1 %v3673_v0 }
 0x345   : > { %v1742_v45 = vpop.permute.xlu1 %1741  ;;  %3448 = vmatpush3.msk.msra.mxu1 %vm1732_vm13, %v1727_v38  ;;  %3449 = vmatprep.mubr.msk.f32.mxu1 %vm3674_vm0, %v3673_v0 }
 0x346   : > { %v2044_v46 = vpop.permute.xlu0 %2043  ;;  %v1746_v47 = vsel %vm211_vm2, %v1742_v45, %v1744_v44  ;;  %3452 = vmatprep.subr.mxu1 %v3673_v0 }
 0x347   : > { %1754 = vmatprep.subr.mxu0 %v1746_v47 }
 0x349   : > { %v1740_v48 = vpop.permute.xlu1 %1739 }
 0x34a   : > { %v1745_v49 = vsel %vm211_vm2, %v1740_v48, %v1742_v45  ;;  %v2042_v50 = vpop.permute.xlu0 %2041 }
 0x34b   : > { %1755 = vmatpush1.msra.mxu0 %v1745_v49  ;;  %v2047_v57 = vsel %vm524_vm4, %v2042_v50, %v2044_v46 }
 0x34c   : > { %3330 = vmatmul.mubr.msk.f32.vlgmr.msra.gmra.mrb[2].mxu0 %vm1750_vm14, %v3329_v43  ;;  %1898 = vmatprep.subr.mxu0 %v1726_v41 }
 0x34d   : > { %3450 = vmatmul.mubr.msk.f32.vlgmr.msra.gmra.mrb[2].mxu1 %vm1750_vm14, %v1734_v51  ;;  %v2046_v52 = vpop.permute.xlu1 %2045  ;;  %3333 = vmatpush1.msk.msra.mxu0 %vm3332_vm15, %v1720_v40 }
 0x34e   : > { %3453 = vmatpush3.msra.mxu1 %v2046_v52  ;;  %v2048_v53 = vsel %vm524_vm4, %v2044_v46, %v2046_v52  ;;  %1962 = vmatprep.mubr.f32.mxu0 %v3673_v0  ;;  %v2206_v54 = vpop.permute.xlu0 %2205 }
 0x34f   : > { %2055 = vmatprep.subr.mxu0 %v2048_v53  ;;  %3454 = vmatprep.mubr.msk.f32.mxu1 %vm3674_vm0, %v3673_v0 }
 0x350   : > { %3457 = vmatprep.subr.mxu1 %v3673_v0 }
 0x351   : > { %v2204_v55 = vpop.permute.xlu1 %2203 }
 0x352   : > { %v2208_v61 = vsel %vm688_vm5, %v2204_v55, %v2206_v54  ;;  %v2364_v63 = vpop.permute.xlu0 %2363 }
 0x354   : > { %3334 = vmatmul.mubr.msk.f32.vlgmr.msra.gmra.mrb[2].mxu0 %vm1750_vm14, %v1734_v51 }
 0x355   : > { %2056 = vmatpush1.msra.mxu0 %v2047_v57  ;;  %3455 = vmatmul.mubr.msk.f32.vlgmr.msra.gmra.mrb[2].mxu1 %vm1750_vm14, %v3337_v56  ;;  %v2202_v58 = vpop.permute.xlu1 %2201 }
 0x356   : > { %3458 = vmatpush3.msra.mxu1 %v2206_v54  ;;  %2215 = vmatprep.subr.mxu0 %v2208_v61  ;;  %v2207_v3 = vsel %vm688_vm5, %v2202_v58, %v2204_v55  ;;  %v2362_v4 = vpop.permute.xlu0 %2361 }
 0x357   : > { %2119 = vmatprep.mubr.f32.mxu0 %v3673_v0  ;;  %3459 = vmatprep.mubr.msk.f32.mxu1 %vm3674_vm0, %v3673_v0  ;;  %v2367_v10 = vsel %vm852_vm6, %v2362_v4, %v2364_v63 }
 0x358   : > { %3462 = vmatprep.subr.mxu1 %v3673_v0 }
 0x359   : > { %v2366_v1 = vpop.permute.xlu1 %2365 }
 0x35a   : > { %v2368_v6 = vsel %vm852_vm6, %v2364_v63, %v2366_v1  ;;  %v2526_v7 = vpop.permute.xlu0 %2525 }
 0x35c   : > { %3338 = vmatmul.mubr.msk.f32.vlgmr.msra.gmra.mrb[2].mxu0 %vm1750_vm14, %v3337_v56 }
 0x35d   : > { %2216 = vmatpush1.msra.mxu0 %v2207_v3  ;;  %3460 = vmatmul.mubr.msk.f32.vlgmr.msra.gmra.mrb[2].mxu1 %vm1750_vm14, %v3340_v2  ;;  %v2524_v5 = vpop.permute.xlu1 %2523 }
 0x35e   : > { %3463 = vmatpush3.msra.mxu1 %v2366_v1  ;;  %2375 = vmatprep.subr.mxu0 %v2368_v6  ;;  %v2528_v11 = vsel %vm1016_vm7, %v2524_v5, %v2526_v7  ;;  %v2684_v12 = vpop.permute.xlu0 %2683 }
 0x35f   : > { %2279 = vmatprep.mubr.f32.mxu0 %v3673_v0  ;;  %3464 = vmatprep.mubr.msk.f32.mxu1 %vm3674_vm0, %v3673_v0 }
 0x360   : > { %3467 = vmatprep.subr.mxu1 %v3673_v0 }
 0x361   : > { %v2522_v8 = vpop.permute.xlu1 %2521 }
 0x362   : > { %v2527_v15 = vsel %vm1016_vm7, %v2522_v8, %v2524_v5  ;;  %v2682_v17 = vpop.permute.xlu0 %2681 }
 0x363   : > { %v2687_v20 = vsel %vm1180_vm8, %v2682_v17, %v2684_v12 }
 0x364   : > { %3341 = vmatmul.mubr.msk.f32.vlgmr.msra.gmra.mrb[2].mxu0 %vm1750_vm14, %v3340_v2 }
 0x365   : > { %2376 = vmatpush1.msra.mxu0 %v2367_v10  ;;  %3465 = vmatmul.mubr.msk.f32.vlgmr.msra.gmra.mrb[2].mxu1 %vm1750_vm14, %v3343_v9  ;;  %v2686_v13 = vpop.permute.xlu1 %2685 }
 0x366   : > { %3468 = vmatpush3.msra.mxu1 %v2526_v7  ;;  %2535 = vmatprep.subr.mxu0 %v2528_v11  ;;  %v2688_v16 = vsel %vm1180_vm8, %v2684_v12, %v2686_v13  ;;  %v2846_v21 = vpop.permute.xlu0 %2845 }
 0x367   : > { %2439 = vmatprep.mubr.f32.mxu0 %v3673_v0  ;;  %3469 = vmatprep.mubr.msk.f32.mxu1 %vm3674_vm0, %v3673_v0 }
 0x368   : > { %3472 = vmatprep.subr.mxu1 %v3673_v0 }
 0x369   : > { %v2844_v18 = vpop.permute.xlu1 %2843 }
 0x36a   : > { %v2848_v23 = vsel %vm1344_vm9, %v2844_v18, %v2846_v21  ;;  %v3004_v26 = vpop.permute.xlu0 %3003 }
 0x36c   : > { %3344 = vmatmul.mubr.msk.f32.vlgmr.msra.gmra.mrb[2].mxu0 %vm1750_vm14, %v3343_v9 }
 0x36d   : > { %2536 = vmatpush1.msra.mxu0 %v2527_v15  ;;  %3470 = vmatmul.mubr.msk.f32.vlgmr.msra.gmra.mrb[2].mxu1 %vm1750_vm14, %v3346_v14  ;;  %v2842_v22 = vpop.permute.xlu1 %2841 }
 0x36e   : > { %3473 = vmatpush3.msra.mxu1 %v2686_v13  ;;  %2695 = vmatprep.subr.mxu0 %v2688_v16  ;;  %v2847_v27 = vsel %vm1344_vm9, %v2842_v22, %v2844_v18  ;;  %v3002_v29 = vpop.permute.xlu0 %3001 }
 0x36f   : > { %2599 = vmatprep.mubr.f32.mxu0 %v3673_v0  ;;  %3474 = vmatprep.mubr.msk.f32.mxu1 %vm3674_vm0, %v3673_v0  ;;  %v3007_v31 = vsel %vm1508_vm10, %v3002_v29, %v3004_v26 }
 0x370   : > { %3477 = vmatprep.subr.mxu1 %v3673_v0 }
 0x371   : > { %v3006_v24 = vpop.permute.xlu1 %3005 }
 0x372   : > { %v3008_v28 = vsel %vm1508_vm10, %v3004_v26, %v3006_v24 }
 0x374   : > { %3347 = vmatmul.mubr.msk.f32.vlgmr.msra.gmra.mrb[2].mxu0 %vm1750_vm14, %v3346_v14 }
 0x375   : > { %2696 = vmatpush1.msra.mxu0 %v2687_v20  ;;  %3475 = vmatmul.mubr.msk.f32.vlgmr.msra.gmra.mrb[2].mxu1 %vm1750_vm14, %v3349_v19 }
 0x376   : > { %3478 = vmatpush3.msra.mxu1 %v2846_v21  ;;  %2855 = vmatprep.subr.mxu0 %v2848_v23 }
 0x377   : > { %2759 = vmatprep.mubr.f32.mxu0 %v3673_v0  ;;  %3479 = vmatprep.mubr.msk.f32.mxu1 %vm3674_vm0, %v3673_v0 }
 0x378   : > { %3482 = vmatprep.subr.mxu1 %v3673_v0 }
 0x37c   : > { %3350 = vmatmul.mubr.msk.f32.vlgmr.msra.gmra.mrb[2].mxu0 %vm1750_vm14, %v3349_v19 }
 0x37d   : > { %2856 = vmatpush1.msra.mxu0 %v2847_v27  ;;  %3480 = vmatmul.mubr.msk.f32.vlgmr.msra.gmra.mrb[2].mxu1 %vm1750_vm14, %v3352_v25 }
 0x37e   : > { %3483 = vmatpush3.msra.mxu1 %v3006_v24  ;;  %3015 = vmatprep.subr.mxu0 %v3008_v28 }
 0x37f   : > { %2919 = vmatprep.mubr.f32.mxu0 %v3673_v0  ;;  %3484 = vmatprep.mubr.msk.f32.mxu1 %vm3674_vm0, %v3673_v0 }
 0x384   : > { %3353 = vmatmul.mubr.msk.f32.vlgmr.msra.gmra.mrb[2].mxu0 %vm1750_vm14, %v3352_v25 }
 0x385   : > { %3016 = vmatpush1.msra.mxu0 %v3007_v31  ;;  %3485 = vmatmul.mubr.msk.f32.vlgmr.msra.gmra.mrb[2].mxu1 %vm1750_vm14, %v3355_v30 }
 0x386   : > { %3079 = vmatprep.mubr.f32.mxu0 %v3673_v0 }
 0x38c   : > { %3356 = vmatmul.mubr.msk.f32.vlgmr.msra.gmra.mrb[2].mxu0 %vm1750_vm14, %v3355_v30 }
 0x458   : > { %v3152_v32 = vpop.f32.mrb[2].mxu1 }
 0x459   : > { %v3486_v33 = vpop.f32.mrb[3].mxu1  ;;  %v3161_v34 = vmul.f32 %v3152_v32, %v3918_v59 }
 0x45b   : > { %v3169_v39 = vmul.f32 %v3161_v34, %v3161_v34  ;;  %v3163_v43 = vsel %vm1684_vm11, %v3161_v34, 0.0 }
 0x45d   : > { %v3171_v45 = vsel %vm1684_vm11, %v3169_v39, 0.0 }
 0x45f   : > { %v3081_v35 = vpop.f32.mrb[2].mxu0 }
 0x460   : > { %v3159_v36 = vmul.f32 %v3081_v35, %v3920_v60  ;;  %v3083_v37 = vpop.f32.mrb[3].mxu0 }
 0x461   : > { %v3160_v38 = vmul.f32 %v3083_v37, %v3922_v62 }
 0x462   : > { %v3167_v40 = vmul.f32 %v3159_v36, %v3159_v36 }
 0x463   : > { %v3162_v41 = vadd.f32 %v3160_v38, %v3159_v36  ;;  %v3168_v42 = vmul.f32 %v3160_v38, %v3160_v38 }
 0x465   : > { %v3164_v0 = vadd.f32 %v3163_v43, %v3162_v41  ;;  %v3170_v44 = vadd.f32 %v3168_v42, %v3167_v40 }
 0x467   : > { %3165 = vadd.xlane.f32.xlu1 %v3164_v0  ;;  %v3172_v46 = vadd.f32 %v3171_v45, %v3170_v44 }
 0x469   : > { %3173 = vadd.xlane.f32.xlu0 %v3172_v46 }
 0x4f4   : > { %v3166_v47 = vpop.xlane.xlu1 %3165 }
 0x4f5   : > { %v3175_v48 = vmul.f32 0.00390625, %v3166_v47 }
 0x4f6   : > { %v3174_v49 = vpop.xlane.xlu0 %3173 }
 0x4f7   : > { %v3176_v50 = vmul.f32 0.00390625, %v3174_v49  ;;  %v3177_v51 = vmul.f32 %v3175_v48, %v3175_v48  ;;  %v3180_v55 = vsub.f32 %v3081_v35, %v3175_v48  ;;  %v3181_v56 = vsub.f32 %v3083_v37, %v3175_v48 }
 0x4f8   : > { %v3182_v57 = vsub.f32 %v3152_v32, %v3175_v48 }
 0x4f9   : > { %v3178_v52 = vsub.f32 %v3176_v50, %v3177_v51 }
 0x4fb   : > { %v3179_v53 = vmax.f32 %v3178_v52, 0.0 }
 0x4fd   : > { %v3183_v54 = vadd.f32 1e-05, %v3179_v53 }
 0x4ff   : > { %3607 = vrsqrt.f32 %v3183_v54 }
 0x509   : > { %v3608_v58 = vpop.eup %3607 }
 0x50a   : > { %v3185_v61 = vmul.f32 %v3608_v58, %v3180_v55  ;;  %v3186_v63 = vmul.f32 %v3608_v58, %v3181_v56  ;;  %v3187_v1 = vmul.f32 %v3608_v58, %v3182_v57 }
 0x50c   : > { %v3188_v2 = vmax.f32 %v3185_v61, 0.0  ;;  %v3189_v3 = vmax.f32 %v3186_v63, 0.0  ;;  %v3190_v4 = vmax.f32 %v3187_v1, 0.0 }
 0x50e   : > { %v3191_v5 = vmul.f32 %v3188_v2, %v3920_v60  ;;  %v3192_v6 = vmul.f32 %v3189_v3, %v3922_v62  ;;  %v3193_v7 = vmul.f32 %v3190_v4, %v3918_v59 }
 0x510   : > { %3194 = vst [vmem:[%s190_s10] sm:$0xff] %v3191_v5  ;;  %3195 = vst [vmem:[%s190_s10 + $0x8] sm:$0xff] %v3192_v6 }
 0x511   : > { %3196 = vst.msk [vmem:[%s190_s10 + $0x10] sm:$0xff] %vm1684_vm11, %v3193_v7 }
 0x512   : > { %3622 = shalt.err (!%p3619_p3)
}
 0x513   : > { %s3623_s5 = scalar_lea.hbm %s4068_s23, 384  ;;  %s3627_s22 = scalar_lea.hbm %s4115_s4, 768 }
 0x514   : > { %p3624_p4 = scmp.ne.s32.totalorder %s4068_s23, %s3623_s5  ;;  %p3628_p9 = scmp.lt.u32.totalorder %s4068_s23, %s4115_s4 }
 0x515   : > { %p3629_p10 = scmp.lt.u32.totalorder %s3627_s22, %s3623_s5  ;;  %p3631_p12 = scmp.lt.u32.totalorder %s3623_s5, %s4068_s23 }
 0x516   : > { %p3625_p7 = pnand %p3624_p4, %p3748_p5 }
 0x517   : > { %p3630_p11 = por %p3629_p10, %p3628_p9 }
 0x518   : > { %p3626_p8 = pneg %p3625_p7 }
 0x519   : > { %p3632_p13 = por %p3631_p12, %p3630_p11 }
 0x51b   : > { %p3633_p0 = pnand %p3632_p13, %p3626_p8 }
 0x51d   : > { %3636 = shalt.err (!%p3633_p0)
}
 0x51e   : > { %3554 = dma.vmem_to_hbm [thread:$0]  (%p3748_p5), %s4070_s11, 384, %s4068_s23, %s3198_s19  }
 0x51f PF: > { %p3560_p1 = scmp.ge.s32.totalorder %s3671_s18, 2  ;;  %s3224_s8 = sand.u32 1, %s3659_s15  }
 0x520   : > { %s3225_s9 = scalar_lea.sflag [#allocation3], %s3224_s8 }
 0x521   : > { %p3557_p2 = pnand %p3560_p1, %p3752_p6 }
 0x523   : > { %3654 = dma.done.wait (!%p3557_p2), %s3225_s9, 384  }
 0x524   : > { %3656 = vsyncadd (!%p3557_p2), %s3225_s9, 4294966912  ;;  %p14_p3 = scmp.ge.s32.totalorder %s3735_s21, 4   ;;  %s4118_s15 = smov %s3663_s16 }
 0x525   : > { %s4119_s16 = smov %s3667_s17  ;;  %s4120_s17 = smov %s3746_s24 }
 0x526   : > { %s4121_s18 = smov %s3735_s21  ;;  %16 = sbr.rel (!%p14_p3) target bundleno = 3 (0x3), region = 87 }
 0x52d   :  { %3230 = vsyncpa [#allocation3], 1 }
 0x52e   :  { %3232 = vsyncpa [#allocation3 + $0x1], 1 }

</bundles_post_ra>
